<compile_context>
chip_gen: v6e
topology: v6e:2x2x1
jax: 0.10.0
libtpu: 0.0.40
codegen_flags: <defaults>
</compile_context>

<pallas_src>
import functools

import jax
import jax.numpy as jnp
from jax.experimental import pallas as pl
from jax.experimental.pallas import tpu as pltpu

_MB = 1024 * 1024


# ---------------------------------------------------------------------------
# Hardware / tiling helpers
# ---------------------------------------------------------------------------
def _vmem_capacity_bytes():
    """Physical VMEM per TensorCore (128 MiB v5e/v6e, 64 MiB v7x)."""
    try:
        info = pltpu.get_tpu_info()
        cap = getattr(info, "vmem_capacity_bytes", None)
        if cap:
            return int(cap)
    except Exception:
        pass
    return 64 * _MB  # conservative (v7x per-TC) fallback


def _sublane_multiple(itemsize):
    # f32 -> 8, bf16/f16 -> 16, int8/fp8 -> 32 (native sublane packing)
    return {4: 8, 2: 16, 1: 32}.get(int(itemsize), 8)


def _plan_tiles(rows, max_tile, sub_mult, min_tile=256):
    """Return (tile_rows, padded_rows).

    tile divides padded_rows, tile <= max_tile, and tile is either the full
    extent or a multiple of sub_mult.  Never exceeds the VMEM budget (no
    full-extent fallback) and never degrades to tiny tiles: if no good divisor
    exists we pad the row count (padding values are chosen to be neutral).
    """
    max_tile = max(sub_mult, min(int(max_tile), 1024))
    if rows <= max_tile:
        return rows, rows                       # full extent: always layout-legal
    aligned_max = max(sub_mult, (max_tile // sub_mult) * sub_mult)
    lo = min(min_tile, aligned_max)
    t = aligned_max
    while t >= lo:
        if rows % t == 0:
            return t, rows
        t -= sub_mult
    padded = ((rows + aligned_max - 1) // aligned_max) * aligned_max
    return aligned_max, padded


def _pad_last(a, target, value):
    pad = target - a.shape[-1]
    if pad <= 0:
        return a
    cfg = [(0, 0)] * (a.ndim - 1) + [(0, pad)]
    return jnp.pad(a, cfg, constant_values=value)


# ---------------------------------------------------------------------------
# Kernel 1: KL(teacher/T || student/T) partial sums.
#   inputs : (C, TR, 128) tiles, channel reduction over the leading axis (VPU).
#   output : (1, 1, 128) per (batch, chunk) lane-dense partial sums.
#   scratch: (TR, 128) f32 accumulator, resident across the inner pixel axis.
# ---------------------------------------------------------------------------
def _kd_kernel(s_ref, t_ref, out_ref, acc_ref, *, inv_temp):
    i = pl.program_id(2)

    @pl.when(i == 0)
    def _():
        acc_ref[...] = jnp.zeros_like(acc_ref)

    s = s_ref[...].astype(jnp.float32) * inv_temp      # (C, TR, 128)
    t = t_ref[...].astype(jnp.float32) * inv_temp      # (C, TR, 128)

    s_shift = s - jnp.max(s, axis=0, keepdims=True)
    t_shift = t - jnp.max(t, axis=0, keepdims=True)
    e_s = jnp.exp(s_shift)
    e_t = jnp.exp(t_shift)                              # reused for p_t and log p_t
    z_s = jnp.sum(e_s, axis=0, keepdims=True)           # (1, TR, 128)
    z_t = jnp.sum(e_t, axis=0, keepdims=True)           # (1, TR, 128)

    # sum_c p_t*(log p_t - log p_s)
    #   = (1/z_t) * sum_c e_t * ((t_shift - s_shift) + (log z_s - log z_t))
    # -> one divide + two logs per pixel, no (C,TR,128) p_t / log_p temporaries.
    log_ratio = jnp.log(z_s) - jnp.log(z_t)              # (1, TR, 128)
    inner = jnp.sum(e_t * ((t_shift - s_shift) + log_ratio), axis=0)   # (TR, 128)
    acc_ref[...] += inner * pl.reciprocal(z_t[0], approx=False)

    @pl.when(i == pl.num_programs(2) - 1)
    def _():
        # single cross-sublane reduce per (batch, chunk); lane-dense store.
        out_ref[...] = jnp.sum(acc_ref[...], axis=0, keepdims=True).reshape(1, 1, 128)


# ---------------------------------------------------------------------------
# Kernel 2: supervised-branch partial sums over the binary logits:
#   row 0: sum(BCE-with-logits), row 1: sum(sigmoid*y), row 2: sum(sigmoid),
#   row 3: sum(y).  Single merged (4, 128) lane-dense output.
# ---------------------------------------------------------------------------
def _sup_kernel(x_ref, y_ref, out_ref, acc_ref):
    i = pl.program_id(0)

    @pl.when(i == 0)
    def _():
        acc_ref[...] = jnp.zeros_like(acc_ref)

    x = x_ref[...].astype(jnp.float32)
    y = y_ref[...].astype(jnp.float32)        # GT may arrive bool/uint8/float

    e = jnp.exp(-jnp.abs(x))                  # one exp, shared by BCE and sigmoid
    recip = pl.reciprocal(1.0 + e, approx=True)
    sig = jnp.where(x >= 0.0, recip, e * recip)          # == sigmoid(x)
    bce = jnp.maximum(x, 0.0) - x * y + jnp.log1p(e)     # stable BCE-with-logits

    acc_ref[0] += bce
    acc_ref[1] += sig * y
    acc_ref[2] += sig
    acc_ref[3] += y

    @pl.when(i == pl.num_programs(0) - 1)
    def _():
        out_ref[...] = jnp.sum(acc_ref[...], axis=1)     # (4, 128)


# ---------------------------------------------------------------------------
# Wrapper (reshape / padding / scalar combination in JAX; no transposes).
# ---------------------------------------------------------------------------
def enhanced_hybrid_distillation_loss(
    student_output,
    student_output_binary,
    teacher_output,
    ground_truth=None,
    *,
    alpha=0.5,
    temperature=3.0,
    dice_weight=0.3,
    focal_weight=0.2,
):
    N, C, H, W = student_output.shape
    HW = H * W

    vmem_cap = _vmem_capacity_bytes()
    # Total tile footprint budget (buffered inputs + live f32 temps + scratch):
    # ~72 MiB on 128 MiB parts (v5e/v6e), ~38 MiB on 64 MiB parts (v7x).
    budget_total = min(int(vmem_cap * 0.6), 72 * _MB)
    vmem_limit = int(min(vmem_cap - 8 * _MB, budget_total + 32 * _MB))

    itemsize = jnp.dtype(student_output.dtype).itemsize
    sub_mult = _sublane_multiple(itemsize)
    n_buf = 3 if vmem_cap >= 96 * _MB else 2   # 3rd input buffer is free on v5e/v6e

    rows = (HW + 127) // 128
    # bytes per row-of-128-pixels: buffered inputs + ~6x f32 live temps + scratch.
    per_tr = 128 * (2 * n_buf * C * itemsize + 6 * C * 4 + 16)
    max_tr = max(sub_mult, budget_total // per_tr)
    tr, padded_rows = _plan_tiles(rows, max_tr, sub_mult)
    n_tiles = padded_rows // tr

    # v7x megacore: if the batch axis alone cannot fill 2 cores (N odd), split the
    # pixel tiles into an outer parallel chunk axis with per-chunk partial outputs.
    n_chunks = 2 if (N % 2 == 1 and n_tiles % 2 == 0 and n_tiles >= 2) else 1
    inner_tiles = n_tiles // n_chunks
    use_triple = (n_buf == 3) and (inner_tiles >= 3)

    # Free, contiguous reshape of NCHW (no HBM transpose).  Zero-pad the pixel
    # axis: zero logits in BOTH student & teacher -> identical uniform softmax
    # -> the padded pixels contribute exactly 0 to the KL sum.
    s3 = _pad_last(student_output.reshape(N, C, HW), padded_rows * 128, 0)
    t3 = _pad_last(teacher_output.reshape(N, C, HW), padded_rows * 128, 0)
    s4 = s3.reshape(N, C, padded_rows, 128)
    t4 = t3.reshape(N, C, padded_rows, 128)

    in_kwargs = {"pipeline_mode": pl.Buffered(3)} if use_triple else {}
    kd_in_spec = pl.BlockSpec(
        (None, C, tr, 128),
        lambda n, c, i, _it=inner_tiles: (n, 0, c * _it + i, 0),
        **in_kwargs,
    )

    kd_elems = N * C * padded_rows * 128
    kd_cost = pl.CostEstimate(
        flops=int(10 * kd_elems),
        transcendentals=int(2 * kd_elems + 3 * N * padded_rows * 128),
        bytes_accessed=int(2 * kd_elems * itemsize + N * n_chunks * 128 * 4),
    )

    kd_partials = pl.pallas_call(
        functools.partial(_kd_kernel, inv_temp=1.0 / temperature),
        out_shape=jax.ShapeDtypeStruct((N * n_chunks, 1, 128), jnp.float32),
        grid_spec=pltpu.PrefetchScalarGridSpec(
            num_scalar_prefetch=0,
            grid=(N, n_chunks, inner_tiles),
            in_specs=[kd_in_spec, kd_in_spec],
            out_specs=pl.BlockSpec(
                (1, 1, 128),
                lambda n, c, i, _nc=n_chunks: (n * _nc + c, 0, 0)),
            scratch_shapes=[pltpu.VMEM((tr, 128), jnp.float32)],
        ),
        compiler_params=pltpu.CompilerParams(
            dimension_semantics=("parallel", "parallel", "arbitrary"),
            vmem_limit_bytes=vmem_limit),
        cost_estimate=kd_cost,
    )(s4, t4)

    kd_sum = jnp.sum(kd_partials)
    # reduction='batchmean' divides by the first dim only (PyTorch semantics).
    kd_loss = kd_sum / N * (alpha * temperature ** 2)

    if ground_truth is None:
        return kd_loss

    P2 = int(student_output_binary.size)
    x_item = jnp.dtype(student_output_binary.dtype).itemsize
    y_item = jnp.dtype(ground_truth.dtype).itemsize
    sub2 = _sublane_multiple(min(x_item, y_item))
    rows2 = (P2 + 127) // 128
    per_tr2 = 128 * (4 * (x_item + y_item) + 10 * 4 + 16)
    max_tr2 = max(sub2, budget_total // per_tr2)
    tr2, padded_rows2 = _plan_tiles(rows2, max_tr2, sub2)

    # Neutral padding: x = -1e4 (sigmoid -> 0, BCE -> 0 exactly), y = 0.
    xb = _pad_last(student_output_binary.reshape(-1), padded_rows2 * 128, -1e4)
    yb = _pad_last(ground_truth.reshape(-1), padded_rows2 * 128, 0)
    xb = xb.reshape(padded_rows2, 128)
    yb = yb.reshape(padded_rows2, 128)

    sup_elems = padded_rows2 * 128
    sup_cost = pl.CostEstimate(
        flops=int(12 * sup_elems),
        transcendentals=int(3 * sup_elems),
        bytes_accessed=int(sup_elems * (x_item + y_item) + 4 * 128 * 4),
    )

    sums = pl.pallas_call(
        _sup_kernel,
        out_shape=jax.ShapeDtypeStruct((4, 128), jnp.float32),
        grid_spec=pltpu.PrefetchScalarGridSpec(
            num_scalar_prefetch=0,
            grid=(padded_rows2 // tr2,),
            in_specs=[
                pl.BlockSpec((tr2, 128), lambda i: (i, 0)),
                pl.BlockSpec((tr2, 128), lambda i: (i, 0)),
            ],
            out_specs=pl.BlockSpec((4, 128), lambda i: (0, 0)),
            scratch_shapes=[pltpu.VMEM((4, tr2, 128), jnp.float32)],
        ),
        compiler_params=pltpu.CompilerParams(
            dimension_semantics=("arbitrary",),
            vmem_limit_bytes=vmem_limit),
        cost_estimate=sup_cost,
    )(xb, yb)

    bce_sum = jnp.sum(sums[0])
    inter = jnp.sum(sums[1])
    sig_sum = jnp.sum(sums[2])
    tgt_sum = jnp.sum(sums[3])

    bce_mean = bce_sum / P2                      # F.binary_cross_entropy_with_logits (mean)
    supervised_loss = bce_mean

    # TODO(synk): standard Dice/Focal assumed; swap in project's definitions if different.
    smooth = 1.0
    dice = (2.0 * inter + smooth) / (sig_sum + tgt_sum + smooth)
    dice_loss = 1.0 - dice
    focal_alpha, focal_gamma = 0.8, 2.0
    focal_loss = focal_alpha * (1.0 - jnp.exp(-bce_mean)) ** focal_gamma * bce_mean

    # NOTE: kd_loss already contains (alpha*T^2) and is multiplied by alpha again
    # below — this exactly matches the PyTorch module's forward.
    total = (
        kd_loss * alpha
        + supervised_loss * (1.0 - alpha)
        + dice_weight * dice_loss
        + focal_weight * focal_loss
    )
    return total


# ---------------------------------------------------------------------------
# Pure-JAX reference (correctness sanity check only)
# ---------------------------------------------------------------------------
def _reference(student_output, student_output_binary, teacher_output, ground_truth,
               alpha=0.5, temperature=3.0, dice_weight=0.3, focal_weight=0.2):
    T = temperature
    N = student_output.shape[0]
    log_ps = jax.nn.log_softmax(student_output / T, axis=1)
    pt = jax.nn.softmax(teacher_output / T, axis=1)
    log_pt = jax.nn.log_softmax(teacher_output / T, axis=1)
    kd = jnp.sum(pt * (log_pt - log_ps)) / N * (alpha * T ** 2)
    if ground_truth is None:
        return kd

    x = student_output_binary
    y = ground_truth
    bce = jnp.mean(jnp.maximum(x, 0.0) - x * y + jnp.log1p(jnp.exp(-jnp.abs(x))))
    sig = jax.nn.sigmoid(x)
    dice = (2.0 * jnp.sum(sig * y) + 1.0) / (jnp.sum(sig) + jnp.sum(y) + 1.0)
    dice_loss = 1.0 - dice
    focal = 0.8 * (1.0 - jnp.exp(-bce)) ** 2.0 * bce
    return kd * alpha + bce * (1 - alpha) + dice_weight * dice_loss + focal_weight * focal


if __name__ == "__main__":
    key = jax.random.PRNGKey(0)
    k1, k2, k3, k4 = jax.random.split(key, 4)

    # student/teacher segmentation logits: NCHW = (2, 4, 16, 16)
    student_output = jax.random.normal(k1, (2, 4, 16, 16), jnp.float32)
    teacher_output = jax.random.normal(k2, (2, 4, 16, 16), jnp.float32)
    # binary-head logits and ground truth mask: (2, 1, 16, 16)
    student_output_binary = jax.random.normal(k3, (2, 1, 16, 16), jnp.float32)
    ground_truth = (jax.random.uniform(k4, (2, 1, 16, 16)) > 0.5).astype(jnp.float32)

    # Full path (KD + supervised + dice + focal)
    loss = enhanced_hybrid_distillation_loss(
        student_output, student_output_binary, teacher_output, ground_truth
    )
    loss = jax.block_until_ready(loss)
    ref = _reference(student_output, student_output_binary, teacher_output, ground_truth)
    assert jnp.allclose(loss, ref, rtol=1e-3, atol=1e-4), (float(loss), float(ref))

    # ground_truth=None path (KD only)
    loss_kd = enhanced_hybrid_distillation_loss(
        student_output, student_output_binary, teacher_output, None
    )
    loss_kd = jax.block_until_ready(loss_kd)
    ref_kd = _reference(student_output, student_output_binary, teacher_output, None)
    assert jnp.allclose(loss_kd, ref_kd, rtol=1e-3, atol=1e-4), (float(loss_kd), float(ref_kd))

    print("KERNEL_OK")
</pallas_src>

<mosaic_0001>
module attributes {stable_mosaic.version = 11 : i64} {
  func.func @_kd_kernel(%arg0: i32, %arg1: i32, %arg2: i32, %arg3: memref<1x4x2x128xf32, #tpu.memory_space<vmem>>, %arg4: memref<1x4x2x128xf32, #tpu.memory_space<vmem>>, %arg5: memref<1x1x128xf32, #tpu.memory_space<vmem>>, %arg6: memref<2x128xf32, #tpu.memory_space<vmem>>) attributes {dimension_semantics = [#tpu.dimension_semantics<parallel>, #tpu.dimension_semantics<parallel>, #tpu.dimension_semantics<arbitrary>], iteration_bounds = array<i64: 2, 1, 1>, scalar_prefetch = 0 : i64, scratch_operands = 1 : i64, tpu.core_type = #tpu.core_type<tc>, window_params = [{transform_indices = @transform_0, window_bounds = array<i64: 1, 4, 2, 128>}, {transform_indices = @transform_1, window_bounds = array<i64: 1, 4, 2, 128>}, {transform_indices = @transform_2, window_bounds = array<i64: 1, 1, 128>}]} {
    %c0_i32 = arith.constant 0 : i32
    %0 = arith.cmpi eq, %arg2, %c0_i32 : i32
    %1 = arith.extui %0 : i1 to i32
    %c0_i32_0 = arith.constant 0 : i32
    %2 = arith.cmpi ne, %1, %c0_i32_0 : i32
    scf.if %2 {
      %cst_20 = arith.constant 0.000000e+00 : f32
      %42 = vector.broadcast %cst_20 : f32 to vector<2x128xf32>
      %c0_21 = arith.constant 0 : index
      %c0_22 = arith.constant 0 : index
      %43 = vector.load %arg6[%c0_21, %c0_22] : memref<2x128xf32, #tpu.memory_space<vmem>>, vector<2x128xf32>
      tpu.vector_store %arg6[%c0_21, %c0_22], %42 {strides = array<i32>} : memref<2x128xf32, #tpu.memory_space<vmem>>, vector<2x128xf32>,
    } else {
    }
    %c0 = arith.constant 0 : index
    %c0_1 = arith.constant 0 : index
    %c0_2 = arith.constant 0 : index
    %c0_3 = arith.constant 0 : index
    %3 = vector.load %arg3[%c0, %c0_1, %c0_2, %c0_3] : memref<1x4x2x128xf32, #tpu.memory_space<vmem>>, vector<1x4x2x128xf32>
    %4 = vector.shape_cast %3 : vector<1x4x2x128xf32> to vector<4x2x128xf32>
    %cst = arith.constant 0.333333343 : f32
    %5 = vector.broadcast %cst : f32 to vector<4x2x128xf32>
    %6 = arith.mulf %4, %5 : vector<4x2x128xf32>
    %c0_4 = arith.constant 0 : index
    %c0_5 = arith.constant 0 : index
    %c0_6 = arith.constant 0 : index
    %c0_7 = arith.constant 0 : index
    %7 = vector.load %arg4[%c0_4, %c0_5, %c0_6, %c0_7] : memref<1x4x2x128xf32, #tpu.memory_space<vmem>>, vector<1x4x2x128xf32>
    %8 = vector.shape_cast %7 : vector<1x4x2x128xf32> to vector<4x2x128xf32>
    %cst_8 = arith.constant 0.333333343 : f32
    %9 = vector.broadcast %cst_8 : f32 to vector<4x2x128xf32>
    %10 = arith.mulf %8, %9 : vector<4x2x128xf32>
    %cst_9 = arith.constant dense<0xFF800000> : vector<2x128xf32>
    %11 = vector.multi_reduction <maximumf>, %6, %cst_9 [0] : vector<4x2x128xf32> to vector<2x128xf32>
    %12 = vector.shape_cast %11 : vector<2x128xf32> to vector<1x2x128xf32>
    %13 = vector.broadcast %12 : vector<1x2x128xf32> to vector<4x2x128xf32>
    %14 = arith.subf %6, %13 : vector<4x2x128xf32>
    %cst_10 = arith.constant dense<0xFF800000> : vector<2x128xf32>
    %15 = vector.multi_reduction <maximumf>, %10, %cst_10 [0] : vector<4x2x128xf32> to vector<2x128xf32>
    %16 = vector.shape_cast %15 : vector<2x128xf32> to vector<1x2x128xf32>
    %17 = vector.broadcast %16 : vector<1x2x128xf32> to vector<4x2x128xf32>
    %18 = arith.subf %10, %17 : vector<4x2x128xf32>
    %19 = math.exp %14 : vector<4x2x128xf32>
    %20 = math.exp %18 : vector<4x2x128xf32>
    %cst_11 = arith.constant dense<0.000000e+00> : vector<2x128xf32>
    %21 = vector.multi_reduction <add>, %19, %cst_11 [0] : vector<4x2x128xf32> to vector<2x128xf32>
    %22 = vector.shape_cast %21 : vector<2x128xf32> to vector<1x2x128xf32>
    %cst_12 = arith.constant dense<0.000000e+00> : vector<2x128xf32>
    %23 = vector.multi_reduction <add>, %20, %cst_12 [0] : vector<4x2x128xf32> to vector<2x128xf32>
    %24 = vector.shape_cast %23 : vector<2x128xf32> to vector<1x2x128xf32>
    %25 = math.log %22 : vector<1x2x128xf32>
    %26 = math.log %24 : vector<1x2x128xf32>
    %27 = arith.subf %25, %26 : vector<1x2x128xf32>
    %28 = arith.subf %18, %14 : vector<4x2x128xf32>
    %29 = vector.broadcast %27 : vector<1x2x128xf32> to vector<4x2x128xf32>
    %30 = arith.addf %28, %29 : vector<4x2x128xf32>
    %31 = arith.mulf %20, %30 : vector<4x2x128xf32>
    %cst_13 = arith.constant dense<0.000000e+00> : vector<2x128xf32>
    %32 = vector.multi_reduction <add>, %31, %cst_13 [0] : vector<4x2x128xf32> to vector<2x128xf32>
    %c0_14 = arith.constant 0 : index
    %c0_15 = arith.constant 0 : index
    %33 = vector.load %arg6[%c0_14, %c0_15] : memref<2x128xf32, #tpu.memory_space<vmem>>, vector<2x128xf32>
    %34 = vector.shape_cast %24 : vector<1x2x128xf32> to vector<2x128xf32>
    %35 = tpu.reciprocal %34 : vector<2x128xf32> -> vector<2x128xf32>
    %36 = arith.mulf %32, %35 : vector<2x128xf32>
    %37 = arith.addf %33, %36 : vector<2x128xf32>
    %c0_16 = arith.constant 0 : index
    %c0_17 = arith.constant 0 : index
    %38 = vector.load %arg6[%c0_16, %c0_17] : memref<2x128xf32, #tpu.memory_space<vmem>>, vector<2x128xf32>
    tpu.vector_store %arg6[%c0_16, %c0_17], %37 {strides = array<i32>} : memref<2x128xf32, #tpu.memory_space<vmem>>, vector<2x128xf32>,
    %c0_i32_18 = arith.constant 0 : i32
    %39 = arith.cmpi eq, %arg2, %c0_i32_18 : i32
    %40 = arith.extui %39 : i1 to i32
    %c0_i32_19 = arith.constant 0 : i32
    %41 = arith.cmpi ne, %40, %c0_i32_19 : i32
    scf.if %41 {
      %c0_20 = arith.constant 0 : index
      %c0_21 = arith.constant 0 : index
      %42 = vector.load %arg6[%c0_20, %c0_21] : memref<2x128xf32, #tpu.memory_space<vmem>>, vector<2x128xf32>
      %cst_22 = arith.constant dense<0.000000e+00> : vector<128xf32>
      %43 = vector.multi_reduction <add>, %42, %cst_22 [0] : vector<2x128xf32> to vector<128xf32>
      %44 = vector.shape_cast %43 : vector<128xf32> to vector<1x128xf32>
      %45 = vector.shape_cast %44 : vector<1x128xf32> to vector<1x1x128xf32>
      %c0_23 = arith.constant 0 : index
      %c0_24 = arith.constant 0 : index
      %c0_25 = arith.constant 0 : index
      %46 = vector.load %arg5[%c0_23, %c0_24, %c0_25] : memref<1x1x128xf32, #tpu.memory_space<vmem>>, vector<1x1x128xf32>
      tpu.vector_store %arg5[%c0_23, %c0_24, %c0_25], %45 {strides = array<i32>} : memref<1x1x128xf32, #tpu.memory_space<vmem>>, vector<1x1x128xf32>,
    } else {
    }
    return
  }
  func.func @transform_0(%arg0: i32, %arg1: i32, %arg2: i32) -> (i32, i32, i32, i32) {
    %c1_i32 = arith.constant 1 : i32
    %0 = arith.muli %arg1, %c1_i32 : i32
    %1 = arith.addi %0, %arg2 : i32
    %c0_i32 = arith.constant 0 : i32
    %c0_i32_0 = arith.constant 0 : i32
    %c0_i32_1 = arith.constant 0 : i32
    return %arg0, %c0_i32, %1, %c0_i32_0 : i32, i32, i32, i32
  }
  func.func @transform_1(%arg0: i32, %arg1: i32, %arg2: i32) -> (i32, i32, i32, i32) {
    %c1_i32 = arith.constant 1 : i32
    %0 = arith.muli %arg1, %c1_i32 : i32
    %1 = arith.addi %0, %arg2 : i32
    %c0_i32 = arith.constant 0 : i32
    %c0_i32_0 = arith.constant 0 : i32
    %c0_i32_1 = arith.constant 0 : i32
    return %arg0, %c0_i32, %1, %c0_i32_0 : i32, i32, i32, i32
  }
  func.func @transform_2(%arg0: i32, %arg1: i32, %arg2: i32) -> (i32, i32, i32) {
    %c1_i32 = arith.constant 1 : i32
    %0 = arith.muli %arg0, %c1_i32 : i32
    %1 = arith.addi %0, %arg1 : i32
    %c0_i32 = arith.constant 0 : i32
    %c0_i32_0 = arith.constant 0 : i32
    %c0_i32_1 = arith.constant 0 : i32
    return %1, %c0_i32, %c0_i32_0 : i32, i32, i32
  }
}

</mosaic_0001>

<bundles_post_ra>
// kernel: tpu_custom_call.1
= control target key start
LH: loop header
LB: loop body
LE: loop exit
PB: predicated region body
PF: predicated region fallthrough
CT: control target
= control target key end

     0   :  { %7 = vsyncpa [#allocation4], 0  ;;  %s935_s0 = inlined_call_operand.hbm [shape: f32[2,4,2,128], index: 0, kind: input, shape index: {}]   ;;  %s936_s1 = inlined_call_operand.hbm [shape: f32[2,4,2,128], index: 1, kind: input, shape index: {}]   ;;  %s937_s2 = inlined_call_operand.hbm [shape: f32[2,1,128], index: 2, kind: output, shape index: {}]  }
   0x1   :  { %9 = vsyncpa [#allocation4 + $0x1], 0 }
   0x2   :  { %10 = vsyncpa [#allocation7], 0 }
   0x3   :  { %12 = vsyncpa [#allocation7 + $0x1], 0 }
   0x4   :  { %13 = vsyncpa [#allocation5], 0 }
   0x5   :  { %15 = vsyncpa [#allocation5 + $0x1], 0  ;;  %s746_s9 = smov 0   ;;  %s748_s10 = smov 0  }
   0x6   :  { %s750_s11 = smov 0   ;;  %s752_s12 = smov 0  }
   0x7   :  { %s754_s13 = smov 0   ;;  %s756_s14 = smov 0  }
   0x8 LB: > { %s473_s15 = sadd.s32 4294967295, %s723_s14   ;;  %s474_s16 = sadd.s32 4294967294, %s723_s14   ;;  %s723_s14 = sphi %s756_s14, %s21_s14   ;;  %s719_s13 = sphi %s754_s13, %s949_s13   ;;  %s715_s12 = sphi %s752_s12, %s948_s12   ;;  %s711_s11 = sphi %s750_s11, %s947_s11   ;;  %s707_s10 = sphi %s748_s10, %s946_s10   ;;  %s703_s9 = sphi %s746_s9, %s945_s9  }
   0x9   : > { %s40_s17 = sadd.s32 1, %s719_s13  ;;  %s51_s18 = sadd.s32 1, %s711_s11 }
   0xa   : > { %p42_p0 = scmp.ge.s32.totalorder %s40_s17, 2  ;;  %p58_p1 = scmp.ne.s32.totalorder %s711_s11, %s707_s10 }
   0xb   : > { %p59_p2 = scmp.eq.s32.totalorder %s723_s14, 0  ;;  %p64_p3 = scmp.ne.s32.totalorder %s707_s10, %s703_s9 }
   0xc   : > { %s951_s17 = smov (%p42_p0, %s40_s17), 0  ;;  %p65_p5 = scmp.eq.s32.totalorder %s473_s15, 0 }
   0xd   : > { %p787_p4 = por %p59_p2, %p58_p1  ;;  %s46_s20 = ssub.s32 %s719_s13, %s951_s17 }
   0xe   : > { %p120_p6 = scmp.eq.s32.totalorder %s473_s15, 1  ;;  %p49_p7 = scmp.eq.s32.totalorder %s46_s20, 0 }
   0xf   : > { %p793_p8 = por %p65_p5, %p64_p3  ;;  %p126_p10 = scmp.eq.s32.totalorder %s474_s16, 1 }
  0x10   : > { %p797_p9 = por %p120_p6, %p58_p1  ;;  %p508_p13 = scmp.lt.s32.totalorder %s723_s14, 2 }
  0x11   : > { %s802_s23 = scalar_select %p49_p7, %s711_s11, %s51_s18  }
  0x12   : > { %p804_p11 = por %p126_p10, %p64_p3  ;;  %s811_s25 = sand.u32 1, %s711_s11  }
  0x13   : > { %s477_s26 = sshll.u32 %s811_s25, 3  ;;  %s489_s27 = sshll.u32 %s719_s13, 7 }
  0x14   : > { %s158_s30 = scalar_lea.hbm %s935_s0, %s489_s27  ;;  %s150_s3 = scalar_lea.vmem [#allocation3], %s477_s26 }
  0x15   : > { %s159_s4 = sshll.u32 %s150_s3, 4  ;;  %p824_p0 = pnand %p508_p13, %p787_p4  ;;  %s160_s4 = int_to_ptr.vmem [resolvable:$true] %s159_s4 }
  0x16   : > { %p483_p1 = scmp.ge.s32.totalorder %s723_s14, 1  ;;  %s147_s6 = scalar_lea.sflag [#allocation4], %s811_s25 }
  0x17   : > { %p585_p2 = pneg %p824_p0  ;;  %s596_s7 = scalar_lea.vmem %s160_s4, 128 }
  0x18   : > { %p597_p3 = scmp.ne.s32.totalorder %s160_s4, %s596_s7  ;;  %s725_s8 = smov [#allocation3]  }
  0x19   : > { %s601_s15 = sshll.u32 %s725_s8, 4  ;;  %s602_s15 = int_to_ptr.vmem [resolvable:$false] %s601_s15 }
  0x1a   : > { %p599_p5 = pnand %p597_p3, %p585_p2  ;;  %s603_s16 = scalar_lea.vmem %s602_s15, 256 }
  0x1b   : > { %p604_p4 = scmp.lt.s32.totalorder %s160_s4, %s602_s15  ;;  %p605_p7 = scmp.lt.s32.totalorder %s603_s16, %s596_s7 }
  0x1c   : > { %p600_p6 = pneg %p599_p5 }
  0x1d   : > { %p606_p10 = por %p605_p7, %p604_p4 }
  0x1f   : > { %p607_p13 = pnand %p606_p10, %p600_p6 }
  0x21   : > { %610 = shalt.err (!%p607_p13)
}
  0x22   : > { %s726_s18 = smov 32   ;;  %s727_s19 = smov 2  }
  0x23   : > { %500 = dma.hbm_to_vmem [thread:$0]  (!%p824_p0), %s158_s30, 128, %s160_s4, %s147_s6, %s726_s18, %s726_s18, %s727_s19  }
  0x24   : > { %p190_p3 = scmp.lt.s32.totalorder %s723_s14, 3  ;;  %s181_s29 = scalar_lea.hbm %s936_s1, %s489_s27 }
  0x25   : > { %s173_s7 = scalar_lea.vmem [#allocation6], %s477_s26  ;;  %s170_s15 = scalar_lea.sflag [#allocation7], %s811_s25 }
  0x26   : > { %p845_p5 = pnand %p483_p1, %p190_p3  ;;  %s182_s8 = sshll.u32 %s173_s7, 4  ;;  %s183_s8 = int_to_ptr.vmem [resolvable:$true] %s182_s8 }
  0x27   : > { %s624_s16 = scalar_lea.vmem %s183_s8, 128  ;;  %s728_s30 = smov [#allocation6]  }
  0x28   : > { %p625_p6 = scmp.ne.s32.totalorder %s183_s8, %s624_s16  ;;  %s629_s4 = sshll.u32 %s728_s30, 4  ;;  %s630_s4 = int_to_ptr.vmem [resolvable:$false] %s629_s4 }
  0x29   : > { %s631_s27 = scalar_lea.vmem %s630_s4, 256  ;;  %p632_p10 = scmp.lt.s32.totalorder %s183_s8, %s630_s4 }
  0x2a   : > { %p627_p4 = pnand %p625_p6, %p585_p2  ;;  %p633_p1 = scmp.lt.s32.totalorder %s631_s27, %s624_s16 }
  0x2c   : > { %p628_p7 = pneg %p627_p4  ;;  %p634_p13 = por %p633_p1, %p632_p10 }
  0x2e   : > { %p635_p3 = pnand %p634_p13, %p628_p7 }
  0x30   : > { %638 = shalt.err (!%p635_p3)
}
  0x31   : > { %503 = dma.hbm_to_vmem [thread:$0]  (!%p824_p0), %s181_s29, 128, %s183_s8, %s170_s15, %s726_s18, %s726_s18, %s727_s19  }
  0x32   : > { %194 = sbr.rel (%p845_p5) target bundleno = 167 (0xa7), region = 28  ;;  %s860_s25 = sand.u32 (!%p845_p5), 1, %s707_s10  }
  0x33   : > { %s484_s26 = sshll.u32 (!%p845_p5), %s860_s25, 3  ;;  %s197_s6 = scalar_lea.sflag (!%p845_p5), [#allocation4], %s860_s25 }
  0x34   : > { %s200_s20 = scalar_lea.vmem (!%p845_p5), [#allocation3], %s484_s26 }
  0x37   : > { %690 = dma.done.wait (%p793_p8), %s197_s6, 128  }
  0x38   : > { %692 = vsyncadd (%p793_p8), %s197_s6, 4294967168  ;;  %s206_s5 = scalar_lea.sflag [#allocation7], %s860_s25  ;;  %s209_s18 = scalar_lea.vmem [#allocation6], %s484_s26 }
  0x39   : > { %694 = dma.done.wait (%p793_p8), %s206_s5, 128  }
  0x3a   : > { %696 = vsyncadd (%p793_p8), %s206_s5, 4294967168  ;;  %v729_v0 = vmov 0.0   ;;  %vm258_vm0 = vcmask 1041408   ;;  %v242_v1 = vld [vmem:[%s200_s20] sm:$0x3]  ;;  %s233_s21 = scalar_lea.vmem [#allocation8], %s860_s25 }
  0x3b   : > { %241 = vst [vmem:[#allocation2] sm:$0x3] %v729_v0  ;;  %v243_v2 = vld [vmem:[%s200_s20 + $0x2] sm:$0x3]  ;;  %v244_v3 = vld [vmem:[%s200_s20 + $0x4] sm:$0x3] }
  0x3c   : > { %v245_v4 = vld [vmem:[%s200_s20 + $0x6] sm:$0x3]  ;;  %v246_v5 = vmul.f32 0.33333334, %v242_v1  ;;  %v247_v6 = vmul.f32 0.33333334, %v243_v2 }
  0x3d   : > { %v248_v7 = vmul.f32 0.33333334, %v244_v3  ;;  %v249_v8 = vmul.f32 0.33333334, %v245_v4  ;;  %v250_v9 = vld [vmem:[%s209_s18] sm:$0x3] }
  0x3e   : > { %v251_v10 = vld [vmem:[%s209_s18 + $0x2] sm:$0x3]  ;;  %v252_v11 = vld [vmem:[%s209_s18 + $0x4] sm:$0x3]  ;;  %v253_v12 = vld [vmem:[%s209_s18 + $0x6] sm:$0x3] }
  0x3f   : > { %v254_v13 = vmul.f32 0.33333334, %v250_v9  ;;  %v255_v14 = vmul.f32 0.33333334, %v251_v10  ;;  %v256_v15 = vmul.f32 0.33333334, %v252_v11 }
  0x40   : > { %v257_v16 = vmul.f32 0.33333334, %v253_v12  ;;  %v259_v17 = vsel %vm258_vm0, %v246_v5, -inf  ;;  %v260_v18 = vsel %vm258_vm0, %v247_v6, -inf  ;;  %v261_v19 = vsel %vm258_vm0, %v248_v7, -inf  ;;  %s366_s19 = sshll.u32 %s233_s21, 4  ;;  %s367_s19 = int_to_ptr.vmem [resolvable:$true] %s366_s19 }
  0x41   : > { %v262_v20 = vsel %vm258_vm0, %v249_v8, -inf  ;;  %v263_v21 = vmax.f32 %v259_v17, %v260_v18  ;;  %v270_v22 = vsel %vm258_vm0, %v254_v13, -inf  ;;  %v271_v23 = vsel %vm258_vm0, %v255_v14, -inf  ;;  %s486_s28 = sshll.u32 %s715_s12, 4  ;;  %s353_s8 = scalar_lea.sflag [#allocation5], %s860_s25 }
  0x42   : > { %v264_v24 = vmax.f32 %v261_v19, %v262_v20  ;;  %v272_v25 = vsel %vm258_vm0, %v256_v15, -inf  ;;  %v273_v26 = vsel %vm258_vm0, %v257_v16, -inf  ;;  %v274_v27 = vmax.f32 %v270_v22, %v271_v23  ;;  %s364_s7 = scalar_lea.hbm %s937_s2, %s486_s28  ;;  %s639_s15 = scalar_lea.vmem %s367_s19, 16 }
  0x43   : > { %v275_v28 = vmax.f32 %v272_v25, %v273_v26  ;;  %p640_p8 = scmp.ne.s32.totalorder %s367_s19, %s639_s15  ;;  %s730_s16 = smov [#allocation8]  }
  0x44   : > { %v265_v29 = vmax.f32 %v263_v21, %v264_v24  ;;  %s643_s30 = sshll.u32 %s730_s16, 4  ;;  %s644_s30 = int_to_ptr.vmem [resolvable:$false] %s643_s30 }
  0x45   : > { %v276_v30 = vmax.f32 %v274_v27, %v275_v28  ;;  %p641_p0 = pnand %p640_p8, %p797_p9  ;;  %s645_s4 = scalar_lea.vmem %s644_s30, 32 }
  0x46   : > { %v266_v31 = vsub.f32 %v246_v5, %v265_v29  ;;  %v267_v32 = vsub.f32 %v247_v6, %v265_v29  ;;  %v268_v33 = vsub.f32 %v248_v7, %v265_v29  ;;  %v269_v34 = vsub.f32 %v249_v8, %v265_v29  ;;  %p646_p5 = scmp.lt.s32.totalorder %s367_s19, %s644_s30  ;;  %p647_p6 = scmp.lt.s32.totalorder %s645_s4, %s639_s15 }
  0x47   : > { %v277_v35 = vsub.f32 %v254_v13, %v276_v30  ;;  %v278_v36 = vsub.f32 %v255_v14, %v276_v30  ;;  %v279_v37 = vsub.f32 %v256_v15, %v276_v30  ;;  %v280_v41 = vsub.f32 %v257_v16, %v276_v30  ;;  %v335_v30 = vld [vmem:[#allocation2] sm:$0x3]  ;;  %p642_p2 = pneg %p641_p0 }
  0x48   : > { %v281_v38 = vmul.f32 1.442695, %v266_v31  ;;  %v283_v39 = vmul.f32 1.442695, %v267_v32  ;;  %v285_v40 = vmul.f32 1.442695, %v268_v33  ;;  %p648_p4 = por %p647_p6, %p646_p5 }
  0x49   : > { %v287_v42 = vmul.f32 1.442695, %v269_v34  ;;  %v289_v43 = vmul.f32 1.442695, %v277_v35  ;;  %v291_v44 = vmul.f32 1.442695, %v278_v36  ;;  %v316_v8 = vsub.f32 %v277_v35, %v266_v31 }
  0x4a   : > { %561 = vpow2.f32 %v281_v38  ;;  %v293_v45 = vmul.f32 1.442695, %v279_v37  ;;  %v295_v46 = vmul.f32 1.442695, %v280_v41  ;;  %v317_v10 = vsub.f32 %v278_v36, %v267_v32  ;;  %p649_p7 = pnand %p648_p4, %p642_p2 }
  0x4b   : > { %563 = vpow2.f32 %v283_v39  ;;  %v318_v11 = vsub.f32 %v279_v37, %v268_v33  ;;  %v319_v12 = vsub.f32 %v280_v41, %v269_v34 }
  0x4c   : > { %565 = vpow2.f32 %v285_v40 }
  0x4d   : > { %567 = vpow2.f32 %v287_v42 }
  0x4e   : > { %569 = vpow2.f32 %v289_v43 }
  0x4f   : > { %571 = vpow2.f32 %v291_v44 }
  0x50   : > { %573 = vpow2.f32 %v293_v45 }
  0x51   : > { %575 = vpow2.f32 %v295_v46 }
  0x57   : > { %v562_v47 = vpop.eup %561 }
  0x58   : > { %v564_v48 = vpop.eup %563  ;;  %v297_v49 = vsel %vm258_vm0, %v562_v47, 0.0 }
  0x59   : > { %v566_v50 = vpop.eup %565  ;;  %v298_v51 = vsel %vm258_vm0, %v564_v48, 0.0 }
  0x5a   : > { %v568_v52 = vpop.eup %567  ;;  %v299_v53 = vadd.f32 %v298_v51, %v297_v49  ;;  %v300_v54 = vsel %vm258_vm0, %v566_v50, 0.0 }
  0x5b   : > { %v570_v55 = vpop.eup %569  ;;  %v302_v56 = vsel %vm258_vm0, %v568_v52, 0.0 }
  0x5c   : > { %v572_v57 = vpop.eup %571  ;;  %v301_v58 = vadd.f32 %v300_v54, %v299_v53  ;;  %v304_v59 = vsel %vm258_vm0, %v570_v55, 0.0 }
  0x5d   : > { %v574_v60 = vpop.eup %573  ;;  %v305_v61 = vsel %vm258_vm0, %v572_v57, 0.0 }
  0x5e   : > { %v576_v62 = vpop.eup %575  ;;  %v303_v63 = vadd.f32 %v302_v56, %v301_v58  ;;  %v306_v0 = vadd.f32 %v305_v61, %v304_v59  ;;  %v307_v1 = vsel %vm258_vm0, %v574_v60, 0.0 }
  0x5f   : > { %v309_v2 = vsel %vm258_vm0, %v576_v62, 0.0 }
  0x60   : > { %v308_v3 = vadd.f32 %v307_v1, %v306_v0  ;;  %577 = vlog2.f32 %v303_v63 }
  0x62   : > { %v310_v4 = vadd.f32 %v309_v2, %v308_v3 }
  0x64   : > { %579 = vlog2.f32 %v310_v4 }
  0x65   : > { %581 = vrcp.f32 %v310_v4 }
  0x6d   : > { %v578_v5 = vpop.eup %577 }
  0x6e   : > { %v312_v6 = vmul.f32 0.6931472, %v578_v5 }
  0x71   : > { %v580_v7 = vpop.eup %579 }
  0x72   : > { %v314_v9 = vmul.f32 0.6931472, %v580_v7  ;;  %v582_v28 = vpop.eup %581 }
  0x74   : > { %v315_v13 = vsub.f32 %v312_v6, %v314_v9 }
  0x76   : > { %v320_v14 = vadd.f32 %v316_v8, %v315_v13  ;;  %v321_v15 = vadd.f32 %v317_v10, %v315_v13  ;;  %v322_v16 = vadd.f32 %v318_v11, %v315_v13  ;;  %v323_v17 = vadd.f32 %v319_v12, %v315_v13 }
  0x78   : > { %v324_v18 = vmul.f32 %v570_v55, %v320_v14  ;;  %v325_v19 = vmul.f32 %v572_v57, %v321_v15  ;;  %v326_v20 = vmul.f32 %v574_v60, %v322_v16  ;;  %v327_v21 = vmul.f32 %v576_v62, %v323_v17 }
  0x7a   : > { %v328_v22 = vsel %vm258_vm0, %v324_v18, 0.0  ;;  %v329_v23 = vsel %vm258_vm0, %v325_v19, 0.0  ;;  %v331_v24 = vsel %vm258_vm0, %v326_v20, 0.0  ;;  %v333_v26 = vsel %vm258_vm0, %v327_v21, 0.0 }
  0x7b   : > { %v330_v25 = vadd.f32 %v329_v23, %v328_v22 }
  0x7d   : > { %v332_v27 = vadd.f32 %v331_v24, %v330_v25 }
  0x7f   : > { %v334_v29 = vadd.f32 %v333_v26, %v332_v27 }
  0x81   : > { %v337_v31 = vmul.f32 %v582_v28, %v334_v29 }
  0x83   : > { %v338_v32 = vadd.f32 %v337_v31, %v335_v30 }
  0x85   : > { %339 = vst [vmem:[#allocation2] sm:$0x3] %v338_v32 }
  0x8c   : > { %v343_v33 = vld [vmem:[#allocation2] sm:$0x3] }
  0x8d   : > { %v344_v34 = vsel %vm258_vm0, %v343_v33, 0.0 }
  0x8e   : > { %v345_v35 = vrot.slane %v344_v34, 4 }
  0x90   : > { %v346_v36 = vadd.f32 %v345_v35, %v344_v34 }
  0x92   : > { %v347_v37 = vrot.slane %v346_v36, 2 }
  0x94   : > { %v348_v38 = vadd.f32 %v347_v37, %v346_v36 }
  0x96   : > { %v349_v39 = vrot.slane %v348_v38, 1 }
  0x98   : > { %v350_v40 = vadd.f32 %v349_v39, %v348_v38 }
  0x9a   : > { %351 = vst [vmem:[%s233_s21] sm:$0x1] %v350_v40 }
  0x9b   : > { %652 = shalt.err (!%p649_p7)
}
  0x9c   : > { %s653_s12 = scalar_lea.hbm %s364_s7, 16  ;;  %s657_s26 = scalar_lea.hbm %s937_s2, 32 }
  0x9d   : > { %p654_p10 = scmp.ne.s32.totalorder %s364_s7, %s653_s12  ;;  %p658_p3 = scmp.lt.s32.totalorder %s364_s7, %s937_s2 }
  0x9e   : > { %p659_p8 = scmp.lt.s32.totalorder %s657_s26, %s653_s12 }
  0x9f   : > { %p655_p1 = pnand %p654_p10, %p797_p9 }
  0xa0   : > { %p660_p0 = por %p659_p8, %p658_p3 }
  0xa1   : > { %p656_p13 = pneg %p655_p1 }
  0xa3   : > { %p661_p12 = pnand %p660_p0, %p656_p13 }
  0xa5   : > { %664 = shalt.err (!%p661_p12)
}
  0xa6   : > { %495 = dma.vmem_to_hbm [thread:$0]  (%p797_p9), %s367_s19, 16, %s364_s7, %s353_s8  }
  0xa7 PF: > { %s378_s5 = sand.u32 1, %s703_s9   ;;  %p944_p2 = scmp.ge.s32.totalorder %s723_s14, 2 }
  0xa8   : > { %s379_s18 = scalar_lea.sflag [#allocation5], %s378_s5 }
  0xa9   : > { %p505_p5 = pnand %p944_p2, %p804_p11 }
  0xab   : > { %p506_p6 = pneg %p505_p5 }
  0xad   : > { %698 = dma.done.wait (%p506_p6), %s379_s18, 16  }
  0xae   : > { %700 = vsyncadd (%p506_p6), %s379_s18, 4294967280  ;;  %s21_s14 = sadd.s32 1, %s723_s14   ;;  %s945_s9 = smov %s707_s10 }
  0xaf   : > { %p18_p4 = scmp.ge.s32.totalorder %s21_s14, 4   ;;  %s946_s10 = smov %s711_s11 }
  0xb0   : > { %s947_s11 = smov %s802_s23  ;;  %s948_s12 = smov %s719_s13 }
  0xb1   : > { %s949_s13 = smov %s951_s17  ;;  %20 = sbr.rel (!%p18_p4) target bundleno = 8 (0x8), region = 94 }
  0xb6   :  { %383 = vsyncpa [#allocation4], 1 }
  0xb7   :  { %385 = vsyncpa [#allocation4 + $0x1], 1 }
  0xb8   :  { %386 = vsyncpa [#allocation7], 1 }
  0xb9   :  { %388 = vsyncpa [#allocation7 + $0x1], 1 }
  0xba   :  { %389 = vsyncpa [#allocation5], 1 }
  0xbb   :  { %391 = vsyncpa [#allocation5 + $0x1], 1 }

</bundles_post_ra>
